<compile_context>
chip_gen: v7x
topology: tpu7x:2x2x1
jax: 0.10.0
libtpu: 0.0.40
codegen_flags: <defaults>
</compile_context>

<pallas_src>
import jax
import jax.numpy as jnp
import numpy as np
from jax.experimental import pallas as pl
from jax.experimental.pallas import tpu as pltpu

MIN_RATING = 1
MAX_RATING = 5
_BINS = MAX_RATING                                       # torch.histc(bins=max_rating, ...)
_INV_WIDTH = _BINS / float(MAX_RATING - MIN_RATING)      # 1 / bin width (exactly 1.25)


def _round_up(x, m):
    return (x + m - 1) // m * m


def histmf_kernel(uf_ref, if_ref, ub_ref, ib_ref, ratings_ref, idx_ref, out_ref):
    """One batch tile: MF prediction + histogram mass, packed as (TB, 2)."""
    # ---- prediction: bias_u + bias_i + <u, i>  (row-wise dot: VPU mul + XLU reduce) ----
    pred = (ub_ref[...] + ib_ref[...]
            + jnp.sum(uf_ref[...] * if_ref[...], axis=1, keepdims=True))       # (TB, 1) f32

    # ---- replace the user's original rating for this item with the prediction ----
    TB, R = ratings_ref.shape
    lane = jax.lax.broadcasted_iota(jnp.int32, (TB, R), 1)
    r = jnp.where(lane == idx_ref[...], pred, ratings_ref[...])                # (TB, R)

    # ---- histogram mass (torch.histc semantics, bins=MAX, range=[MIN, MAX]) ----
    valid = ((r >= MIN_RATING) & (r <= MAX_RATING)).astype(jnp.float32)        # histc ignores OOR
    b = jnp.minimum(jnp.floor((r - MIN_RATING) * _INV_WIDTH), _BINS - 1.0)     # f32 bin id

    # _to_index: clip(round(pred), max(min_rating-1, 0), max_rating-1), kept in f32
    min_index = float(max(MIN_RATING - 1, 0))
    end = jnp.clip(jnp.round(pred), min_index, MAX_RATING - 1.0)               # (TB, 1)

    # _calc_histogram_mass: sum(hist[:end]) - 0.5*hist[end-1]   (0 if end == 0)
    #   per-element weight = 1.0 if b < end-1, 0.5 if b == end-1, else 0.0
    #                      = 0.5 * ((b <= end-1) + (b < end-1))
    e1 = end - 1.0
    w = 0.5 * ((b <= e1).astype(jnp.float32) + (b < e1).astype(jnp.float32))
    mass = jnp.sum(w * valid, axis=1, keepdims=True)                           # (TB, 1)

    # single packed output tile: lane 0 = prediction, lane 1 = histogram mass
    out_ref[:, 0:1] = pred
    out_ref[:, 1:2] = mass


def histogram_mf_forward(users, items, params, ratings_by_user, item_to_index, *, tb=1024):
    # Embedding / table gathers (XLA).
    # TODO(synk): fuse these gathers into the pallas_call via scalar-prefetch ids +
    #             per-row DMA gather to halve input HBM traffic on production tables.
    uf = params["user_factors"][users].astype(jnp.float32)          # (B, F)
    itf = params["item_factors"][items].astype(jnp.float32)         # (B, F)
    ub = params["user_biases"][users].astype(jnp.float32)           # (B, 1)
    ib = params["item_biases"][items].astype(jnp.float32)           # (B, 1)
    ratings = ratings_by_user[users].astype(jnp.float32)            # (B, R)
    idx = item_to_index[users, items][:, None].astype(jnp.int32)    # (B, 1)

    B, F = uf.shape
    R = ratings.shape[1]

    # Batch tile: multiple of 8 sublanes; pad B up to a multiple of the tile.
    # Per-tile VMEM (double-buffered) at TB=1024, F=50, R=64 is still << 32 MiB,
    # so the big-tile default is safe; re-derive if F or R grow by ~100x.
    tb = min(_round_up(max(tb, 8), 8), _round_up(B, 8))
    B_pad = _round_up(B, tb)

    def pad(x):
        if B_pad == B:
            return x
        return jnp.pad(x, ((0, B_pad - B),) + ((0, 0),) * (x.ndim - 1))

    uf, itf, ub, ib, ratings, idx = map(pad, (uf, itf, ub, ib, ratings, idx))

    grid = (B_pad // tb,)
    out = pl.pallas_call(
        histmf_kernel,
        out_shape=jax.ShapeDtypeStruct((B_pad, 2), jnp.float32),
        grid=grid,
        in_specs=[pl.BlockSpec((tb, F), lambda i: (i, 0)),
                  pl.BlockSpec((tb, F), lambda i: (i, 0)),
                  pl.BlockSpec((tb, 1), lambda i: (i, 0)),
                  pl.BlockSpec((tb, 1), lambda i: (i, 0)),
                  pl.BlockSpec((tb, R), lambda i: (i, 0)),
                  pl.BlockSpec((tb, 1), lambda i: (i, 0))],
        out_specs=pl.BlockSpec((tb, 2), lambda i: (i, 0)),
        compiler_params=pltpu.CompilerParams(
            dimension_semantics=("parallel",),        # megacore-shard batch axis on v7x
            vmem_limit_bytes=32 * 1024 * 1024),       # ample headroom for these tile sizes
    )(uf, itf, ub, ib, ratings, idx)

    # torch.stack((predictions, histograms_mass), dim=1) -> (B, 2, 1)
    return out[:B, :, None]


def _reference(users, items, params, ratings_by_user, item_to_index):
    """Plain numpy re-implementation of HistogramMF.forward for checking."""
    uf = np.asarray(params["user_factors"])[users]
    itf = np.asarray(params["item_factors"])[items]
    ub = np.asarray(params["user_biases"])[users]
    ib = np.asarray(params["item_biases"])[items]
    rbu = np.asarray(ratings_by_user)
    iti = np.asarray(item_to_index)

    pred = ub + ib + np.sum(uf * itf, axis=1, keepdims=True)        # (B, 1)
    mass = np.empty_like(pred)
    for i, (u, it) in enumerate(zip(users, items)):
        row = rbu[u].copy()
        row[iti[u, it]] = pred[i, 0]
        end = int(np.clip(np.round(pred[i, 0]), max(MIN_RATING - 1, 0), MAX_RATING - 1))
        hist = np.zeros(_BINS, np.float32)
        for v in row:
            if MIN_RATING <= v <= MAX_RATING:
                b = min(int(np.floor((v - MIN_RATING) * _INV_WIDTH)), _BINS - 1)
                hist[b] += 1.0
        if end == 0:
            mass[i, 0] = 0.0
        else:
            mass[i, 0] = hist[:end].sum() - 0.5 * hist[end - 1]
    return np.stack((pred, mass), axis=1)                           # (B, 2, 1)


if __name__ == "__main__":
    key = jax.random.PRNGKey(0)
    n_users, n_items, n_factors = 10, 12, 32
    R = 16          # ratings per user (synthetic, fixed length)
    B = 32          # batch size (tb=8 below -> grid of 4 pipelined steps)

    k = jax.random.split(key, 8)
    # xavier_normal_ init for factor embeddings; small normal for biases.
    std_u = (2.0 / (n_users + n_factors)) ** 0.5
    std_i = (2.0 / (n_items + n_factors)) ** 0.5
    params = {
        "user_factors": std_u * jax.random.normal(k[0], (n_users, n_factors), jnp.float32),
        "item_factors": std_i * jax.random.normal(k[1], (n_items, n_factors), jnp.float32),
        "user_biases": 0.1 * jax.random.normal(k[2], (n_users, 1), jnp.float32),
        "item_biases": 0.1 * jax.random.normal(k[3], (n_items, 1), jnp.float32),
    }
    # Synthetic DataProcessor tables (DataEncoder == identity mapping).
    ratings_by_user = jax.random.randint(
        k[4], (n_users, R), MIN_RATING, MAX_RATING + 1).astype(jnp.float32)
    item_to_index = jax.random.randint(k[5], (n_users, n_items), 0, R).astype(jnp.int32)

    users = jax.random.randint(k[6], (B,), 0, n_users).astype(jnp.int32)
    items = jax.random.randint(k[7], (B,), 0, n_items).astype(jnp.int32)

    out = histogram_mf_forward(users, items, params, ratings_by_user, item_to_index, tb=8)
    out = jax.block_until_ready(out)
    assert out.shape == (B, 2, 1), out.shape

    ref = _reference(np.asarray(users), np.asarray(items), params,
                     ratings_by_user, item_to_index)
    np.testing.assert_allclose(np.asarray(out), ref, rtol=1e-5, atol=1e-5)

    print("KERNEL_OK")
</pallas_src>

<mosaic_0001>
module attributes {stable_mosaic.version = 11 : i64} {
  func.func @histmf_kernel(%arg0: i32, %arg1: memref<8x32xf32, #tpu.memory_space<vmem>>, %arg2: memref<8x32xf32, #tpu.memory_space<vmem>>, %arg3: memref<8x1xf32, #tpu.memory_space<vmem>>, %arg4: memref<8x1xf32, #tpu.memory_space<vmem>>, %arg5: memref<8x16xf32, #tpu.memory_space<vmem>>, %arg6: memref<8x1xi32, #tpu.memory_space<vmem>>, %arg7: memref<8x2xf32, #tpu.memory_space<vmem>>) attributes {dimension_semantics = [#tpu.dimension_semantics<parallel>], iteration_bounds = array<i64: 4>, scalar_prefetch = 0 : i64, scratch_operands = 0 : i64, tpu.core_type = #tpu.core_type<tc>, window_params = [{transform_indices = @transform_0, window_bounds = array<i64: 8, 32>}, {transform_indices = @transform_1, window_bounds = array<i64: 8, 32>}, {transform_indices = @transform_2, window_bounds = array<i64: 8, 1>}, {transform_indices = @transform_3, window_bounds = array<i64: 8, 1>}, {transform_indices = @transform_4, window_bounds = array<i64: 8, 16>}, {transform_indices = @transform_5, window_bounds = array<i64: 8, 1>}, {transform_indices = @transform_6, window_bounds = array<i64: 8, 2>}]} {
    %c0 = arith.constant 0 : index
    %c0_0 = arith.constant 0 : index
    %0 = vector.load %arg3[%c0, %c0_0] : memref<8x1xf32, #tpu.memory_space<vmem>>, vector<8x1xf32>
    %c0_1 = arith.constant 0 : index
    %c0_2 = arith.constant 0 : index
    %1 = vector.load %arg4[%c0_1, %c0_2] : memref<8x1xf32, #tpu.memory_space<vmem>>, vector<8x1xf32>
    %2 = arith.addf %0, %1 : vector<8x1xf32>
    %c0_3 = arith.constant 0 : index
    %c0_4 = arith.constant 0 : index
    %3 = vector.load %arg1[%c0_3, %c0_4] : memref<8x32xf32, #tpu.memory_space<vmem>>, vector<8x32xf32>
    %c0_5 = arith.constant 0 : index
    %c0_6 = arith.constant 0 : index
    %4 = vector.load %arg2[%c0_5, %c0_6] : memref<8x32xf32, #tpu.memory_space<vmem>>, vector<8x32xf32>
    %5 = arith.mulf %3, %4 : vector<8x32xf32>
    %cst = arith.constant dense<0.000000e+00> : vector<8xf32>
    %6 = vector.multi_reduction <add>, %5, %cst [1] : vector<8x32xf32> to vector<8xf32>
    %7 = vector.shape_cast %6 : vector<8xf32> to vector<8x1xf32>
    %8 = arith.addf %2, %7 : vector<8x1xf32>
    %9 = tpu.iota {dimensions = array<i32: 1>} : vector<8x16xi32>
    %c0_7 = arith.constant 0 : index
    %c0_8 = arith.constant 0 : index
    %10 = vector.load %arg6[%c0_7, %c0_8] : memref<8x1xi32, #tpu.memory_space<vmem>>, vector<8x1xi32>
    %11 = vector.broadcast %10 : vector<8x1xi32> to vector<8x16xi32>
    %12 = arith.cmpi eq, %9, %11 : vector<8x16xi32>
    %c0_9 = arith.constant 0 : index
    %c0_10 = arith.constant 0 : index
    %13 = vector.load %arg5[%c0_9, %c0_10] : memref<8x16xf32, #tpu.memory_space<vmem>>, vector<8x16xf32>
    %14 = vector.shape_cast %8 : vector<8x1xf32> to vector<8x1xf32>
    %15 = vector.broadcast %14 : vector<8x1xf32> to vector<8x16xf32>
    %16 = arith.select %12, %15, %13 : vector<8x16xi1>, vector<8x16xf32>
    %cst_11 = arith.constant 1.000000e+00 : f32
    %17 = vector.broadcast %cst_11 : f32 to vector<8x16xf32>
    %18 = arith.cmpf oge, %16, %17 : vector<8x16xf32>
    %cst_12 = arith.constant 5.000000e+00 : f32
    %19 = vector.broadcast %cst_12 : f32 to vector<8x16xf32>
    %20 = arith.cmpf ole, %16, %19 : vector<8x16xf32>
    %21 = arith.andi %18, %20 : vector<8x16xi1>
    %22 = arith.extui %21 : vector<8x16xi1> to vector<8x16xi32>
    %23 = arith.sitofp %22 : vector<8x16xi32> to vector<8x16xf32>
    %cst_13 = arith.constant 1.000000e+00 : f32
    %24 = vector.broadcast %cst_13 : f32 to vector<8x16xf32>
    %25 = arith.subf %16, %24 : vector<8x16xf32>
    %cst_14 = arith.constant 1.250000e+00 : f32
    %26 = vector.broadcast %cst_14 : f32 to vector<8x16xf32>
    %27 = arith.mulf %25, %26 : vector<8x16xf32>
    %28 = math.floor %27 : vector<8x16xf32>
    %cst_15 = arith.constant 4.000000e+00 : f32
    %29 = vector.broadcast %cst_15 : f32 to vector<8x16xf32>
    %30 = arith.minimumf %28, %29 : vector<8x16xf32>
    %31 = math.roundeven %8 : vector<8x1xf32>
    %cst_16 = arith.constant 0.000000e+00 : f32
    %cst_17 = arith.constant 4.000000e+00 : f32
    %32 = vector.broadcast %cst_16 : f32 to vector<8x1xf32>
    %33 = arith.maximumf %32, %31 : vector<8x1xf32>
    %34 = vector.broadcast %cst_17 : f32 to vector<8x1xf32>
    %35 = arith.minimumf %34, %33 : vector<8x1xf32>
    %cst_18 = arith.constant 1.000000e+00 : f32
    %36 = vector.broadcast %cst_18 : f32 to vector<8x1xf32>
    %37 = arith.subf %35, %36 : vector<8x1xf32>
    %38 = vector.broadcast %37 : vector<8x1xf32> to vector<8x16xf32>
    %39 = arith.cmpf ole, %30, %38 : vector<8x16xf32>
    %40 = arith.extui %39 : vector<8x16xi1> to vector<8x16xi32>
    %41 = arith.sitofp %40 : vector<8x16xi32> to vector<8x16xf32>
    %42 = vector.broadcast %37 : vector<8x1xf32> to vector<8x16xf32>
    %43 = arith.cmpf olt, %30, %42 : vector<8x16xf32>
    %44 = arith.extui %43 : vector<8x16xi1> to vector<8x16xi32>
    %45 = arith.sitofp %44 : vector<8x16xi32> to vector<8x16xf32>
    %46 = arith.addf %41, %45 : vector<8x16xf32>
    %cst_19 = arith.constant 5.000000e-01 : f32
    %47 = vector.broadcast %cst_19 : f32 to vector<8x16xf32>
    %48 = arith.mulf %47, %46 : vector<8x16xf32>
    %49 = arith.mulf %48, %23 : vector<8x16xf32>
    %cst_20 = arith.constant dense<0.000000e+00> : vector<8xf32>
    %50 = vector.multi_reduction <add>, %49, %cst_20 [1] : vector<8x16xf32> to vector<8xf32>
    %51 = vector.shape_cast %50 : vector<8xf32> to vector<8x1xf32>
    %c0_21 = arith.constant 0 : index
    %c0_22 = arith.constant 0 : index
    %52 = vector.load %arg7[%c0_21, %c0_22] : memref<8x2xf32, #tpu.memory_space<vmem>>, vector<8x1xf32>
    tpu.vector_store %arg7[%c0_21, %c0_22], %8 {strides = array<i32>} : memref<8x2xf32, #tpu.memory_space<vmem>>, vector<8x1xf32>,
    %c0_23 = arith.constant 0 : index
    %c1 = arith.constant 1 : index
    %53 = vector.load %arg7[%c0_23, %c1] : memref<8x2xf32, #tpu.memory_space<vmem>>, vector<8x1xf32>
    tpu.vector_store %arg7[%c0_23, %c1], %51 {strides = array<i32>} : memref<8x2xf32, #tpu.memory_space<vmem>>, vector<8x1xf32>,
    return
  }
  func.func @transform_0(%arg0: i32) -> (i32, i32) {
    %c0_i32 = arith.constant 0 : i32
    %c0_i32_0 = arith.constant 0 : i32
    return %arg0, %c0_i32 : i32, i32
  }
  func.func @transform_1(%arg0: i32) -> (i32, i32) {
    %c0_i32 = arith.constant 0 : i32
    %c0_i32_0 = arith.constant 0 : i32
    return %arg0, %c0_i32 : i32, i32
  }
  func.func @transform_2(%arg0: i32) -> (i32, i32) {
    %c0_i32 = arith.constant 0 : i32
    %c0_i32_0 = arith.constant 0 : i32
    return %arg0, %c0_i32 : i32, i32
  }
  func.func @transform_3(%arg0: i32) -> (i32, i32) {
    %c0_i32 = arith.constant 0 : i32
    %c0_i32_0 = arith.constant 0 : i32
    return %arg0, %c0_i32 : i32, i32
  }
  func.func @transform_4(%arg0: i32) -> (i32, i32) {
    %c0_i32 = arith.constant 0 : i32
    %c0_i32_0 = arith.constant 0 : i32
    return %arg0, %c0_i32 : i32, i32
  }
  func.func @transform_5(%arg0: i32) -> (i32, i32) {
    %c0_i32 = arith.constant 0 : i32
    %c0_i32_0 = arith.constant 0 : i32
    return %arg0, %c0_i32 : i32, i32
  }
  func.func @transform_6(%arg0: i32) -> (i32, i32) {
    %c0_i32 = arith.constant 0 : i32
    %c0_i32_0 = arith.constant 0 : i32
    return %arg0, %c0_i32 : i32, i32
  }
}

</mosaic_0001>

<bundles_post_ra>
// kernel: tpu_custom_call.1
= control target key start
LH: loop header
LB: loop body
LE: loop exit
PB: predicated region body
PF: predicated region fallthrough
CT: control target
= control target key end

     0   :  { %s582_s21 = smov 0   ;;  %s627_s0 = inlined_call_operand.vmem [shape: f32[32,32], index: 0, kind: input, shape index: {}]   ;;  %s628_s1 = inlined_call_operand.vmem [shape: f32[32,32], index: 1, kind: input, shape index: {}]   ;;  %s629_s2 = inlined_call_operand.vmem [shape: f32[32,1], index: 2, kind: input, shape index: {}]   ;;  %s630_s3 = inlined_call_operand.vmem [shape: f32[32,1], index: 3, kind: input, shape index: {}]   ;;  %s631_s4 = inlined_call_operand.vmem [shape: f32[32,16], index: 4, kind: input, shape index: {}]   ;;  %s632_s5 = inlined_call_operand.vmem [shape: s32[32,1], index: 5, kind: input, shape index: {}]   ;;  %s633_s6 = inlined_call_operand.vmem [shape: f32[32,2], index: 6, kind: output, shape index: {}]  }
   0x1 LB: > { %s505_s22 = sadd.s32 4294967295, %s543_s21   ;;  %p509_p0 = scmp.ge.s32.totalorder %s543_s21, 1  ;;  %s543_s21 = sphi %s582_s21, %s16_s21  }
   0x2   : > { %p256_p1 = scmp.lt.s32.totalorder %s543_s21, 5 }
   0x4   : > { %p257_p2 = pnand %p509_p0, %p256_p1 }
   0x5   : > { %p304_p3 = scmp.lt.s32.totalorder (!%p257_p2), %s505_s22, 3  ;;  %vm338_vm0 = vcmask (!%p257_p2), 261120   ;;  %v545_v4 = vmov (!%p257_p2), 0   ;;  %vm388_vm1 = vcmask (!%p257_p2), 7168   ;;  %v343_v15 = vlaneseq (!%p257_p2) }
   0x6   : > { %260 = sbr.rel (%p257_p2) target bundleno = 454 (0x1c6), region = 44  ;;  %535 = vset.pattern.permute.xlu0 (!%p257_p2), %v545_v4  ;;  %536 = vset.pattern.permute.xlu1 (!%p257_p2), %v545_v4  ;;  %v546_v26 = vmov (!%p257_p2), 0.0   ;;  %vm384_vm8 = vcmask (!%p257_p2), 130048   ;;  %vm390_vm9 = vcmask (!%p257_p2), 15368  }
   0x7   : > { %v344_v16 = vand.u32 (!%p257_p2), 127, %v343_v15 }
   0xd   : > { %s635_s22 = smov (!%p304_p3, %s505_s22), 3 }
   0xe   : > { %s590_s23 = sshll.u32 %s635_s22, 3 }
   0xf   : > { %s307_s26 = scalar_lea.vmem %s627_s0, %s590_s23  ;;  %s311_s29 = scalar_lea.vmem %s628_s1, %s590_s23 }
  0x10   : > { %v335_v0 = vld [vmem:[%s307_s26] sm:$0xff]  ;;  %s327_s8 = scalar_lea.vmem %s632_s5, %s590_s23  ;;  %s315_s11 = scalar_lea.vmem %s629_s2, %s590_s23 }
  0x11   : > { %v336_v1 = vld [vmem:[%s311_s29] sm:$0xff]  ;;  %s319_s14 = scalar_lea.vmem %s630_s3, %s590_s23  ;;  %s616_s17 = scalar_lea.vmem %s633_s6, %s590_s23 }
  0x12   : > { %v337_v2 = vmul.f32 %v336_v1, %v335_v0  ;;  %v345_v5 = vld [vmem:[%s327_s8] sm:$0xff]  ;;  %s323_s20 = scalar_lea.vmem %s631_s4, %s590_s23 }
  0x13   : > { %v332_v6 = vld [vmem:[%s315_s11] sm:$0xff] }
  0x14   : > { %v339_v3 = vsel %vm338_vm0, %v337_v2, 0.0  ;;  %v333_v7 = vld [vmem:[%s319_s14] sm:$0xff] }
  0x15   : > { %340 = vadd.xlane.f32.xlu0 %v339_v3  ;;  %v334_v8 = vadd.f32 %v333_v7, %v332_v6  ;;  %v350_v18 = vld [vmem:[%s323_s20] sm:$0xff] }
  0x2b   : > { %347 = vperm.xlu0 %535, %v345_v5  }
  0xa2   : > { %v341_v9 = vpop.xlane.xlu0 %340 }
  0xa3   : > { %v342_v10 = vadd.f32 %v341_v9, %v334_v8 }
  0xa5   : > { %v524_v11 = vround.rtne.f32 %v342_v10  ;;  %389 = vst.msk [vmem:[%s616_s17] sm:$0xff] %vm388_vm1, %v342_v10  ;;  %353 = vperm.xlu1 %536, %v342_v10  }
  0xa7   : > { %v367_v12 = vmax.f32 %v524_v11, 0.0 }
  0xa9   : > { %v368_v13 = vmin.f32 %v367_v12, 4.0 }
  0xaa   : > { %v348_v17 = vpop.permute.xlu0 %347 }
  0xab   : > { %v519_v14 = vadd.f32 -1.0, %v368_v13  ;;  %vm349_vm2 = vcmp.eq.s32.totalorder %v344_v16, %v348_v17 }
  0xad   : > { %372 = vperm.xlu1 %536, %v519_v14  }
 0x124   : > { %v354_v19 = vpop.permute.xlu1 %353 }
 0x125   : > { %v356_v20 = vsel %vm349_vm2, %v354_v19, %v350_v18 }
 0x126   : > { %v518_v21 = vadd.f32 -1.0, %v356_v20  ;;  %vm357_vm3 = vcmp.ge.f32.partialorder %v356_v20, 1.0  ;;  %vm358_vm4 = vcmp.le.f32.partialorder %v356_v20, 5.0 }
 0x127   : > { %vm359_vm7 = vmand %vm357_vm3, %vm358_vm4 }
 0x128   : > { %v363_v22 = vmul.f32 1.25, %v518_v21  ;;  %v517_v31 = vsel %vm359_vm7, 1.0, %v546_v26 }
 0x12a   : > { %v364_v23 = vfloor.f32 %v363_v22 }
 0x12c   : > { %v373_v24 = vpop.permute.xlu1 %372  ;;  %v365_v25 = vmin.f32 %v364_v23, 4.0 }
 0x12e   : > { %vm375_vm5 = vcmp.le.f32.partialorder %v365_v25, %v373_v24  ;;  %vm378_vm6 = vcmp.lt.f32.partialorder %v365_v25, %v373_v24 }
 0x12f   : > { %v520_v27 = vsel %vm375_vm5, 1.0, %v546_v26  ;;  %v521_v28 = vsel %vm378_vm6, 1.0, %v546_v26 }
 0x130   : > { %v381_v29 = vadd.f32 %v521_v28, %v520_v27 }
 0x132   : > { %v382_v30 = vmul.f32 0.5, %v381_v29 }
 0x134   : > { %v383_v32 = vmul.f32 %v517_v31, %v382_v30 }
 0x136   : > { %v385_v33 = vsel %vm384_vm8, %v383_v32, 0.0 }
 0x137   : > { %386 = vadd.xlane.f32.xlu1 %v385_v33 }
 0x1c4   : > { %v387_v34 = vpop.xlane.xlu1 %386 }
 0x1c5   : > { %391 = vst.msk [vmem:[%s616_s17] sm:$0xff] %vm390_vm9, %v387_v34 }
 0x1c6 PF: > { %s16_s21 = sadd.s32 1, %s543_s21  }
 0x1c7   : > { %p13_p4 = scmp.ge.s32.totalorder %s16_s21, 6  }
 0x1c9   :  { %15 = sbr.rel (!%p13_p4) target bundleno = 1 (0x1), region = 89 }

</bundles_post_ra>
